<compile_context>
chip_gen: v7x
topology: tpu7x:2x2x1
jax: 0.10.0
libtpu: 0.0.40
codegen_flags: <defaults>
</compile_context>

<pallas_src>
import functools
import math

import jax
import jax.numpy as jnp
from jax.experimental import pallas as pl
from jax.experimental.pallas import tpu as pltpu


def _sdpa_kernel(q_ref, k_ref, v_ref, *out_refs,
                 inv_temperature, emit_attn, emit_score,
                 flatten_out, flatten_scores,
                 approx_reciprocal, mxu_dtype):
    out_ref = out_refs[0]
    pos = 1
    attn_ref = None
    score_ref = None
    if emit_attn:
        attn_ref = out_refs[pos]
        pos += 1
    if emit_score:
        score_ref = out_refs[pos]
        pos += 1

    # Blocks: q (TB, TQ, D), k (TB, Lk, D), v (TB, Lk, Dv), native dtype.
    q = q_ref[...]
    k = k_ref[...]
    v = v_ref[...]

    # Fold 1/temperature into q: scales TQ*D elements instead of TQ*Lk.
    q = q * jnp.asarray(inv_temperature, dtype=q.dtype)

    if mxu_dtype is not None:
        q_mm = q.astype(mxu_dtype)
        k_mm = k.astype(mxu_dtype)
    else:
        q_mm, k_mm = q, k

    # attn_score = (q @ k^T) / temperature, contracting on the last dims so the
    # MXU consumes k directly (no explicit transpose).  f32 accumulation.
    score = jnp.einsum("bqd,bkd->bqk", q_mm, k_mm,
                       preferred_element_type=jnp.float32)      # (TB, TQ, Lk)

    # Softmax over Lk (dim=2 of the full tensor), in f32.  Exact reciprocal by
    # default (approx EUP vrcp is opt-in and loses ~1e-3 relative accuracy).
    m = jnp.max(score, axis=-1, keepdims=True)
    e = jnp.exp(score - m)
    denom = jnp.sum(e, axis=-1, keepdims=True)
    attn = e * pl.reciprocal(denom, approx=approx_reciprocal)

    # TODO(synk): nn.Dropout(attn_dropout) is identity in eval mode; training-
    # mode stochastic dropout (pltpu.prng_*) intentionally not applied here.

    p_dtype = mxu_dtype if mxu_dtype is not None else v.dtype
    out = jnp.einsum("bqk,bkd->bqd", attn.astype(p_dtype), v.astype(p_dtype),
                     preferred_element_type=jnp.float32)        # (TB, TQ, Dv)

    tb, tq, lk = score.shape
    dv = out.shape[-1]

    # Cast first, then flatten: the (TB,TQ,X)->(TB,TQ*X) collapse is a relayout,
    # so it is cheaper on the (possibly narrower) output dtype.
    if flatten_out:
        out_ref[...] = out.astype(out_ref.dtype).reshape(tb, tq * dv)
    else:
        out_ref[...] = out.astype(out_ref.dtype)

    if emit_attn:
        if flatten_scores:
            attn_ref[...] = attn.astype(attn_ref.dtype).reshape(tb, tq * lk)
        else:
            attn_ref[...] = attn.astype(attn_ref.dtype)
    if emit_score:
        if flatten_scores:
            score_ref[...] = score.astype(score_ref.dtype).reshape(tb, tq * lk)
        else:
            score_ref[...] = score.astype(score_ref.dtype)


def _vmem_caps():
    """(default scoped-VMEM limit to request, physical VMEM capacity)."""
    try:
        cap = int(pltpu.get_tpu_info().vmem_capacity_bytes)
    except Exception:
        cap = 64 * 1024 * 1024  # conservative (v7x per-TC size)
    return cap * 3 // 4, cap


def _num_tensorcores():
    """Best-effort TensorCore count (1 if unknown) — gates the megacore split."""
    try:
        info = pltpu.get_tpu_info()
    except Exception:
        return 1
    for attr in ("num_cores", "core_count", "num_tensorcores",
                 "tensor_core_count", "cores_per_chip"):
        n = getattr(info, attr, None)
        if isinstance(n, int) and n > 0:
            return n
    return 1


def _pick_tiles(B, Lq, Lk, D, Dv, in_itemsize, out_itemsize, score_itemsize,
                n_side_outputs, budget_bytes):
    """Largest (TB, TQ) batch/query tiles whose pipelined working set fits VMEM.

    Returns (TB, TQ, estimated_step_bytes).
    """

    def step_bytes(tb, tq):
        io = tb * (tq * D + Lk * D + Lk * Dv) * in_itemsize        # q/k/v blocks
        io += tb * tq * Dv * out_itemsize                          # output block
        io += n_side_outputs * tb * tq * Lk * score_itemsize       # attn/score
        vmem = 2 * io                                              # double buffering
        vmem += tb * tq * (3 * Lk + Dv + 4) * 4                    # f32 intermediates
        return vmem

    tq_cands = [Lq] + sorted((t for t in range(8, Lq, 8) if Lq % t == 0),
                             reverse=True)
    tb_cands = sorted((t for t in range(1, B + 1) if B % t == 0), reverse=True)

    tb, tq = 1, tq_cands[-1]
    found = False
    for cand_tq in tq_cands:
        for cand_tb in tb_cands:
            if step_bytes(cand_tb, cand_tq) <= budget_bytes:
                tb, tq = cand_tb, cand_tq
                found = True
                break
        if found:
            break

    # Megacore: if everything collapsed into one grid step on a multi-TC chip
    # and the problem is non-trivial, split so both cores get work.
    if (found and _num_tensorcores() >= 2
            and (B // tb) * (Lq // tq) == 1
            and B * Lq * Lk >= (1 << 18)):
        if B % 2 == 0:
            tb = B // 2
        elif tq % 16 == 0:
            tq //= 2
    return tb, tq, step_bytes(tb, tq)


def _lane_dense_ok(TB, B, tile_rows, inner):
    """Emit (TB, tile_rows*inner) instead of (TB, tile_rows, inner)?"""
    return (inner % 128 != 0                      # otherwise already lane-dense
            and (tile_rows * inner) % 128 == 0    # flattened block is 128-aligned
            and (TB == B or TB % 8 == 0))         # sublane constraint on dim -2


def scaled_dot_product_attention(q, k, v, temperature, q_sem=None, k_sem=None,
                                 *, approx_reciprocal=False, mxu_dtype=None,
                                 return_attn=True, return_attn_score=True):
    """Pallas equivalent of ScaledDotProductAttention.forward.

    Returns (output, attn, attn_score) exactly as the PyTorch module does
    (attn / attn_score are None when the corresponding return_* flag is False).
    `mxu_dtype=jnp.bfloat16` opts into native-bf16 MXU matmuls for f32 inputs.
    """
    if q_sem is not None:
        # PyTorch recomputes attn_score with (q + q_sem), (k + k_sem); its
        # intermediate `attn_sem` bmm result is never used, so it is skipped.
        q = q + q_sem
        k = k + k_sem

    B, Lq, D = q.shape
    Bk, Lk, Dk = k.shape
    Bv, Lkv, Dv = v.shape
    assert B == Bk == Bv and D == Dk and Lk == Lkv

    score_dtype = jnp.result_type(q.dtype, k.dtype)   # matches torch.bmm promotion
    out_dtype = jnp.result_type(score_dtype, v.dtype)
    in_itemsize = jnp.dtype(q.dtype).itemsize
    out_itemsize = jnp.dtype(out_dtype).itemsize
    score_itemsize = jnp.dtype(score_dtype).itemsize
    n_side = int(return_attn) + int(return_attn_score)

    vmem_limit, vmem_cap = _vmem_caps()
    TB, TQ, step_bytes = _pick_tiles(
        B, Lq, Lk, D, Dv, in_itemsize, out_itemsize, score_itemsize, n_side,
        budget_bytes=int(vmem_limit * 0.8))
    # Graceful fallback: if even the smallest tile overshoots the default
    # scoped limit, request more VMEM (up to physical) rather than failing.
    if step_bytes > int(vmem_limit * 0.8):
        vmem_limit = min(vmem_cap, max(vmem_limit, step_bytes + step_bytes // 4))

    flatten_out = _lane_dense_ok(TB, B, TQ, Dv)
    flatten_scores = n_side > 0 and _lane_dense_ok(TB, B, TQ, Lk)

    grid = (B // TB, Lq // TQ)

    kernel = functools.partial(
        _sdpa_kernel,
        inv_temperature=1.0 / float(temperature),
        emit_attn=return_attn,
        emit_score=return_attn_score,
        flatten_out=flatten_out,
        flatten_scores=flatten_scores,
        approx_reciprocal=approx_reciprocal,
        mxu_dtype=mxu_dtype,
    )

    if flatten_out:
        out_shape0 = jax.ShapeDtypeStruct((B, Lq * Dv), out_dtype)
        out_spec0 = pl.BlockSpec((TB, TQ * Dv), lambda b, qc: (b, qc))
    else:
        out_shape0 = jax.ShapeDtypeStruct((B, Lq, Dv), out_dtype)
        out_spec0 = pl.BlockSpec((TB, TQ, Dv), lambda b, qc: (b, qc, 0))

    if flatten_scores:
        score_shape = jax.ShapeDtypeStruct((B, Lq * Lk), score_dtype)
        score_spec = pl.BlockSpec((TB, TQ * Lk), lambda b, qc: (b, qc))
    else:
        score_shape = jax.ShapeDtypeStruct((B, Lq, Lk), score_dtype)
        score_spec = pl.BlockSpec((TB, TQ, Lk), lambda b, qc: (b, qc, 0))

    out_shapes = [out_shape0]
    out_specs = [out_spec0]
    if return_attn:
        out_shapes.append(score_shape)
        out_specs.append(score_spec)
    if return_attn_score:
        out_shapes.append(score_shape)
        out_specs.append(score_spec)

    grid_spec = pltpu.PrefetchScalarGridSpec(
        num_scalar_prefetch=0,
        grid=grid,
        in_specs=[
            pl.BlockSpec((TB, TQ, D), lambda b, qc: (b, qc, 0)),
            pl.BlockSpec((TB, Lk, D), lambda b, qc: (b, 0, 0)),
            pl.BlockSpec((TB, Lk, Dv), lambda b, qc: (b, 0, 0)),
        ],
        out_specs=out_specs,
    )

    cost = pl.CostEstimate(
        flops=2 * B * Lq * Lk * (D + Dv),
        transcendentals=B * Lq * (Lk + 1),
        bytes_accessed=(q.size + k.size + v.size) * in_itemsize
        + B * Lq * Dv * out_itemsize
        + n_side * B * Lq * Lk * score_itemsize,
    )

    results = pl.pallas_call(
        kernel,
        out_shape=tuple(out_shapes),
        grid_spec=grid_spec,
        compiler_params=pltpu.CompilerParams(
            dimension_semantics=("parallel", "parallel"),
            vmem_limit_bytes=int(vmem_limit),
        ),
        cost_estimate=cost,
    )(q, k, v)

    idx = 0
    output = results[idx]
    idx += 1
    if flatten_out:
        output = output.reshape(B, Lq, Dv)
    attn = None
    if return_attn:
        attn = results[idx]
        idx += 1
        if flatten_scores:
            attn = attn.reshape(B, Lq, Lk)
    attn_score = None
    if return_attn_score:
        attn_score = results[idx]
        idx += 1
        if flatten_scores:
            attn_score = attn_score.reshape(B, Lq, Lk)
    return output, attn, attn_score


def _reference(q, k, v, temperature, q_sem=None, k_sem=None):
    if q_sem is not None:
        q = q + q_sem
        k = k + k_sem
    score = jnp.einsum("bqd,bkd->bqk", q, k) / temperature
    attn = jax.nn.softmax(score, axis=2)
    out = jnp.einsum("bqk,bkd->bqd", attn, v)
    return out, attn, score


if __name__ == "__main__":
    def check(q, k, v, temperature, q_sem=None, k_sem=None):
        out, attn, score = scaled_dot_product_attention(
            q, k, v, temperature, q_sem=q_sem, k_sem=k_sem)
        jax.block_until_ready((out, attn, score))
        r_out, r_attn, r_score = _reference(q, k, v, temperature,
                                            q_sem=q_sem, k_sem=k_sem)
        assert out.shape == r_out.shape
        assert attn.shape == r_attn.shape and score.shape == r_score.shape
        assert jnp.allclose(score, r_score, atol=1e-3, rtol=1e-3)
        assert jnp.allclose(attn, r_attn, atol=1e-3, rtol=1e-3)
        assert jnp.allclose(out, r_out, atol=1e-3, rtol=1e-3)

    key = jax.random.PRNGKey(0)

    # Cases 1 & 2: (B, Lq, Lk, D, Dv) = (2, 8, 8, 32, 32), with/without sem path
    # (exercises the lane-dense (B, Lq*Dv) output slab).
    B, Lq, Lk, D, Dv = 2, 8, 8, 32, 32
    temperature = math.sqrt(D)
    kq, kk, kv, kqs, kks = jax.random.split(key, 5)
    q = jax.random.normal(kq, (B, Lq, D), dtype=jnp.float32)
    k = jax.random.normal(kk, (B, Lk, D), dtype=jnp.float32)
    v = jax.random.normal(kv, (B, Lk, Dv), dtype=jnp.float32)
    q_sem = jax.random.normal(kqs, (B, Lq, D), dtype=jnp.float32)
    k_sem = jax.random.normal(kks, (B, Lk, D), dtype=jnp.float32)
    check(q, k, v, temperature)
    check(q, k, v, temperature, q_sem=q_sem, k_sem=k_sem)

    # Case 3: Lq*Lk == 128 -> exercises the lane-dense attn/attn_score slab too.
    B, Lq, Lk, D, Dv = 2, 8, 16, 32, 32
    kq, kk, kv = jax.random.split(jax.random.PRNGKey(0), 3)
    q = jax.random.normal(kq, (B, Lq, D), dtype=jnp.float32)
    k = jax.random.normal(kk, (B, Lk, D), dtype=jnp.float32)
    v = jax.random.normal(kv, (B, Lk, Dv), dtype=jnp.float32)
    check(q, k, v, math.sqrt(D))

    # Case 4: side-output skipping (output-only path, less HBM write traffic).
    out_only, attn_none, score_none = scaled_dot_product_attention(
        q, k, v, math.sqrt(D), return_attn=False, return_attn_score=False)
    jax.block_until_ready(out_only)
    r_out, _, _ = _reference(q, k, v, math.sqrt(D))
    assert attn_none is None and score_none is None
    assert jnp.allclose(out_only, r_out, atol=1e-3, rtol=1e-3)

    print("KERNEL_OK")
</pallas_src>

<mosaic_0001>
module attributes {stable_mosaic.version = 11 : i64} {
  func.func @_sdpa_kernel(%arg0: i32, %arg1: i32, %arg2: memref<2x8x32xf32, #tpu.memory_space<vmem>>, %arg3: memref<2x8x32xf32, #tpu.memory_space<vmem>>, %arg4: memref<2x8x32xf32, #tpu.memory_space<vmem>>, %arg5: memref<2x256xf32, #tpu.memory_space<vmem>>, %arg6: memref<2x8x8xf32, #tpu.memory_space<vmem>>, %arg7: memref<2x8x8xf32, #tpu.memory_space<vmem>>) attributes {dimension_semantics = [#tpu.dimension_semantics<parallel>, #tpu.dimension_semantics<parallel>], iteration_bounds = array<i64: 1, 1>, scalar_prefetch = 0 : i64, scratch_operands = 0 : i64, tpu.core_type = #tpu.core_type<tc>, window_params = [{transform_indices = @transform_0, window_bounds = array<i64: 2, 8, 32>}, {transform_indices = @transform_1, window_bounds = array<i64: 2, 8, 32>}, {transform_indices = @transform_2, window_bounds = array<i64: 2, 8, 32>}, {transform_indices = @transform_3, window_bounds = array<i64: 2, 256>}, {transform_indices = @transform_4, window_bounds = array<i64: 2, 8, 8>}, {transform_indices = @transform_5, window_bounds = array<i64: 2, 8, 8>}]} {
    %c0 = arith.constant 0 : index
    %c0_0 = arith.constant 0 : index
    %c0_1 = arith.constant 0 : index
    %0 = vector.load %arg2[%c0, %c0_0, %c0_1] : memref<2x8x32xf32, #tpu.memory_space<vmem>>, vector<2x8x32xf32>
    %c0_2 = arith.constant 0 : index
    %c0_3 = arith.constant 0 : index
    %c0_4 = arith.constant 0 : index
    %1 = vector.load %arg3[%c0_2, %c0_3, %c0_4] : memref<2x8x32xf32, #tpu.memory_space<vmem>>, vector<2x8x32xf32>
    %c0_5 = arith.constant 0 : index
    %c0_6 = arith.constant 0 : index
    %c0_7 = arith.constant 0 : index
    %2 = vector.load %arg4[%c0_5, %c0_6, %c0_7] : memref<2x8x32xf32, #tpu.memory_space<vmem>>, vector<2x8x32xf32>
    %cst = arith.constant 0.176776692 : f32
    %3 = vector.broadcast %cst : f32 to vector<2x8x32xf32>
    %4 = arith.mulf %0, %3 : vector<2x8x32xf32>
    "tpu.trace_start"() <{level = 10 : i32, message = "bqd,bkd->bqk"}> : () -> ()
    %cst_8 = arith.constant dense<0.000000e+00> : vector<2x8x8xf32>
    %5 = tpu.matmul %4, %1, %cst_8 {dimension_numbers = #tpu.dot_dimension_numbers<[2], [2], [1], [1], [0, 0, 0, 1, 1, 1], [0], [0]>} : vector<2x8x32xf32>, vector<2x8x32xf32>, vector<2x8x8xf32> -> vector<2x8x8xf32>
    "tpu.trace_stop"() : () -> ()
    %cst_9 = arith.constant dense<0xFF800000> : vector<2x8xf32>
    %6 = vector.multi_reduction <maximumf>, %5, %cst_9 [2] : vector<2x8x8xf32> to vector<2x8xf32>
    %7 = vector.shape_cast %6 : vector<2x8xf32> to vector<2x8x1xf32>
    %8 = vector.broadcast %7 : vector<2x8x1xf32> to vector<2x8x8xf32>
    %9 = arith.subf %5, %8 : vector<2x8x8xf32>
    %10 = math.exp %9 : vector<2x8x8xf32>
    %cst_10 = arith.constant dense<0.000000e+00> : vector<2x8xf32>
    %11 = vector.multi_reduction <add>, %10, %cst_10 [2] : vector<2x8x8xf32> to vector<2x8xf32>
    %12 = vector.shape_cast %11 : vector<2x8xf32> to vector<2x8x1xf32>
    %13 = tpu.reciprocal %12 : vector<2x8x1xf32> -> vector<2x8x1xf32>
    %14 = vector.broadcast %13 : vector<2x8x1xf32> to vector<2x8x8xf32>
    %15 = arith.mulf %10, %14 : vector<2x8x8xf32>
    "tpu.trace_start"() <{level = 10 : i32, message = "bqk,bkd->bqd"}> : () -> ()
    %cst_11 = arith.constant dense<0.000000e+00> : vector<2x8x32xf32>
    %16 = tpu.matmul %15, %2, %cst_11 {dimension_numbers = #tpu.dot_dimension_numbers<[2], [1], [1], [2], [0, 0, 0, 1, 1, 2], [0], [0]>} : vector<2x8x8xf32>, vector<2x8x32xf32>, vector<2x8x32xf32> -> vector<2x8x32xf32>
    "tpu.trace_stop"() : () -> ()
    %17 = vector.shape_cast %16 : vector<2x8x32xf32> to vector<2x256xf32>
    %c0_12 = arith.constant 0 : index
    %c0_13 = arith.constant 0 : index
    %18 = vector.load %arg5[%c0_12, %c0_13] : memref<2x256xf32, #tpu.memory_space<vmem>>, vector<2x256xf32>
    tpu.vector_store %arg5[%c0_12, %c0_13], %17 {strides = array<i32>} : memref<2x256xf32, #tpu.memory_space<vmem>>, vector<2x256xf32>,
    %c0_14 = arith.constant 0 : index
    %c0_15 = arith.constant 0 : index
    %c0_16 = arith.constant 0 : index
    %19 = vector.load %arg6[%c0_14, %c0_15, %c0_16] : memref<2x8x8xf32, #tpu.memory_space<vmem>>, vector<2x8x8xf32>
    tpu.vector_store %arg6[%c0_14, %c0_15, %c0_16], %15 {strides = array<i32>} : memref<2x8x8xf32, #tpu.memory_space<vmem>>, vector<2x8x8xf32>,
    %c0_17 = arith.constant 0 : index
    %c0_18 = arith.constant 0 : index
    %c0_19 = arith.constant 0 : index
    %20 = vector.load %arg7[%c0_17, %c0_18, %c0_19] : memref<2x8x8xf32, #tpu.memory_space<vmem>>, vector<2x8x8xf32>
    tpu.vector_store %arg7[%c0_17, %c0_18, %c0_19], %5 {strides = array<i32>} : memref<2x8x8xf32, #tpu.memory_space<vmem>>, vector<2x8x8xf32>,
    return
  }
  func.func @transform_0(%arg0: i32, %arg1: i32) -> (i32, i32, i32) {
    %c0_i32 = arith.constant 0 : i32
    %c0_i32_0 = arith.constant 0 : i32
    return %arg0, %arg1, %c0_i32 : i32, i32, i32
  }
  func.func @transform_1(%arg0: i32, %arg1: i32) -> (i32, i32, i32) {
    %c0_i32 = arith.constant 0 : i32
    %c0_i32_0 = arith.constant 0 : i32
    %c0_i32_1 = arith.constant 0 : i32
    return %arg0, %c0_i32, %c0_i32_0 : i32, i32, i32
  }
  func.func @transform_2(%arg0: i32, %arg1: i32) -> (i32, i32, i32) {
    %c0_i32 = arith.constant 0 : i32
    %c0_i32_0 = arith.constant 0 : i32
    %c0_i32_1 = arith.constant 0 : i32
    return %arg0, %c0_i32, %c0_i32_0 : i32, i32, i32
  }
  func.func @transform_3(%arg0: i32, %arg1: i32) -> (i32, i32) {
    %c0_i32 = arith.constant 0 : i32
    return %arg0, %arg1 : i32, i32
  }
  func.func @transform_4(%arg0: i32, %arg1: i32) -> (i32, i32, i32) {
    %c0_i32 = arith.constant 0 : i32
    %c0_i32_0 = arith.constant 0 : i32
    return %arg0, %arg1, %c0_i32 : i32, i32, i32
  }
  func.func @transform_5(%arg0: i32, %arg1: i32) -> (i32, i32, i32) {
    %c0_i32 = arith.constant 0 : i32
    %c0_i32_0 = arith.constant 0 : i32
    return %arg0, %arg1, %c0_i32 : i32, i32, i32
  }
}

</mosaic_0001>

<bundles_post_ra>
// kernel: tpu_custom_call.1
= control target key start
LH: loop header
LB: loop body
LE: loop exit
PB: predicated region body
PF: predicated region fallthrough
CT: control target
= control target key end

     0   :  { %11 = vsyncpa [#allocation3], 0  ;;  %s924_s0 = inlined_call_operand.hbm [shape: f32[2,8,32], index: 0, kind: input, shape index: {}]   ;;  %s925_s1 = inlined_call_operand.hbm [shape: f32[2,8,32], index: 1, kind: input, shape index: {}]   ;;  %s926_s2 = inlined_call_operand.hbm [shape: f32[2,8,32], index: 2, kind: input, shape index: {}]   ;;  %s927_s3 = inlined_call_operand.hbm [shape: f32[2,256], index: 3, kind: output, shape index: {0}]   ;;  %s928_s4 = inlined_call_operand.hbm [shape: f32[2,8,8], index: 4, kind: output, shape index: {1}]   ;;  %s929_s5 = inlined_call_operand.hbm [shape: f32[2,8,8], index: 5, kind: output, shape index: {2}]  }
   0x1   :  { %12 = vsyncpa [#allocation6], 0 }
   0x2   :  { %13 = vsyncpa [#allocation4], 0 }
   0x3   :  { %14 = vsyncpa [#allocation10], 0  ;;  %s749_s18 = smov [#allocation5]   ;;  %s750_s20 = smov [#allocation2]  }
   0x4   :  { %s32_s19 = sshll.u32 %s749_s18, 4  ;;  %s20_s21 = sshll.u32 %s750_s20, 4  ;;  %s33_s19 = int_to_ptr.vmem [resolvable:$true] %s32_s19  ;;  %s794_s21 = int_to_ptr.vmem [resolvable:$true] %s20_s21 }
   0x5   :  { %s609_s24 = scalar_lea.hbm %s925_s1, 256 }
   0x6   :  { %p610_p0 = scmp.ne.s32.totalorder %s925_s1, %s609_s24  ;;  %p613_p1 = scmp.lt.u32.totalorder %s609_s24, %s925_s1 }
   0x8   :  { %p615_p2 = pnand %p613_p1, %p610_p0 }
   0xa   :  { %618 = shalt.err (!%p615_p2)
}
   0xb   :  { %s619_s29 = scalar_lea.vmem %s33_s19, 256  ;;  %p624_p4 = scmp.lt.s32.totalorder %s33_s19, %s33_s19 }
   0xc   :  { %p620_p3 = scmp.ne.s32.totalorder %s33_s19, %s619_s29  ;;  %p625_p5 = scmp.lt.s32.totalorder %s619_s29, %s619_s29 }
   0xe   :  { %p626_p6 = por %p625_p5, %p624_p4 }
  0x10   :  { %p627_p7 = pnand %p626_p6, %p620_p3 }
  0x12   :  { %630 = shalt.err (!%p627_p7)
}
  0x13   :  { %s751_s30 = smov 128   ;;  %s752_s6 = smov 8  }
  0x14   :  { %38 = dma.hbm_to_vmem [thread:$0]  %s925_s1, 256, %s33_s19, [#allocation6], %s751_s30, %s751_s30, %s752_s6  }
  0x15   :  { %s631_s11 = scalar_lea.hbm %s924_s0, 256 }
  0x16   :  { %p632_p8 = scmp.ne.s32.totalorder %s924_s0, %s631_s11  ;;  %p635_p9 = scmp.lt.u32.totalorder %s631_s11, %s924_s0 }
  0x18   :  { %p637_p10 = pnand %p635_p9, %p632_p8 }
  0x1a   :  { %640 = shalt.err (!%p637_p10)
}
  0x1b   :  { %s641_s16 = scalar_lea.vmem %s794_s21, 256  ;;  %p646_p12 = scmp.lt.s32.totalorder %s794_s21, %s794_s21 }
  0x1c   :  { %p642_p11 = scmp.ne.s32.totalorder %s794_s21, %s641_s16  ;;  %p647_p13 = scmp.lt.s32.totalorder %s641_s16, %s641_s16 }
  0x1e   :  { %p648_p0 = por %p647_p13, %p646_p12 }
  0x20   :  { %p649_p1 = pnand %p648_p0, %p642_p11 }
  0x22   :  { %652 = shalt.err (!%p649_p1)
}
  0x23   :  { %26 = dma.hbm_to_vmem [thread:$0]  %s924_s0, 256, %s794_s21, [#allocation3], %s751_s30, %s751_s30, %s752_s6  }
  0x24   :  { %s753_s18 = smov [#allocation7]   ;;  %s653_s23 = scalar_lea.hbm %s926_s2, 256 }
  0x25   :  { %s44_s19 = sshll.u32 %s753_s18, 4  ;;  %p654_p2 = scmp.ne.s32.totalorder %s926_s2, %s653_s23  ;;  %s45_s19 = int_to_ptr.vmem [resolvable:$true] %s44_s19 }
  0x26   :  { %p657_p3 = scmp.lt.u32.totalorder %s653_s23, %s926_s2 }
  0x28   :  { %p659_p4 = pnand %p657_p3, %p654_p2 }
  0x2a   :  { %662 = shalt.err (!%p659_p4)
}
  0x2b   :  { %s663_s28 = scalar_lea.vmem %s45_s19, 256  ;;  %p668_p6 = scmp.lt.s32.totalorder %s45_s19, %s45_s19 }
  0x2c   :  { %p664_p5 = scmp.ne.s32.totalorder %s45_s19, %s663_s28  ;;  %p669_p7 = scmp.lt.s32.totalorder %s663_s28, %s663_s28 }
  0x2e   :  { %p670_p8 = por %p669_p7, %p668_p6 }
  0x30   :  { %p671_p9 = pnand %p670_p8, %p664_p5 }
  0x32   :  { %674 = shalt.err (!%p671_p9)
}
  0x33   :  { %50 = dma.hbm_to_vmem [thread:$0]  %s926_s2, 256, %s45_s19, [#allocation6], %s751_s30, %s751_s30, %s752_s6  }
  0x34   :  { %741 = dma.done.wait [#allocation3], 256  }
  0x35   :  { %742 = vsyncadd [#allocation3], 4294967040 }
  0x36   :  { %743 = dma.done.wait [#allocation6], 512  }
  0x37   :  { %744 = vsyncadd [#allocation6], 4294966784  ;;  %v754_v0 = vmov 0.0   ;;  %vm755_vm0 = vmmov 0   ;;  %vm68_vm1 = vcmask 261120   ;;  %v62_v1 = vld [vmem:[#allocation5] sm:$0xff]  ;;  %v394_v33 = vlaneseq }
  0x38   :  { %566 = vmatprep.subr.mxu0 %v754_v0  ;;  %568 = vmatprep.mubr.msk.f32.mxu0 %vm755_vm0, %v754_v0  ;;  %v60_v2 = vld [vmem:[#allocation2] sm:$0xff]  ;;  %v63_v3 = vld [vmem:[#allocation5 + $0x8] sm:$0xff]  ;;  %v61_v5 = vld [vmem:[#allocation2 + $0x8] sm:$0xff]  ;;  %vm221_vm2 = vcmask 64512   ;;  %v756_v31 = vmov 1983009808  }
  0x39   :  { %571 = vmatprep.subr.mxu1 %v754_v0  ;;  %573 = vmatprep.mubr.msk.f32.mxu1 %vm755_vm0, %v754_v0  ;;  %v66_v4 = vmul.f32 0.17677669, %v60_v2  ;;  %v67_v6 = vmul.f32 0.17677669, %v61_v5  ;;  %v64_v23 = vld [vmem:[#allocation7] sm:$0xff]  ;;  %v65_v24 = vld [vmem:[#allocation7 + $0x8] sm:$0xff]  ;;  %v392_v32 = vunpack.c.l.s4 %v756_v31 }
  0x3a   :  { %567 = vmatpush3.xpose.msk.msra.mxu0 %vm68_vm1, %v62_v1  ;;  %572 = vmatpush3.xpose.msk.msra.mxu1 %vm68_vm1, %v63_v3  ;;  %v395_v35 = vshrl.u32 %v394_v33, 7  ;;  %v757_v36 = vmov 1934713408   ;;  %s758_s2 = smov 64   ;;  %s759_s29 = smov [#allocation9]  }
  0x3b   :  { %576 = vmatprep.subr.mxu0 %v754_v0  ;;  %581 = vmatprep.subr.mxu1 %v754_v0  ;;  %v393_v34 = vunpack.c.0.s8 %v392_v32  ;;  %v423_v37 = vunpack.c.l.s4 %v757_v36  ;;  %s519_s7 = sshll.u32 %s759_s29, 4  ;;  %s760_s8 = smov 32   ;;  %s520_s7 = int_to_ptr.vmem [resolvable:$true] %s519_s7 }
  0x3c   :  { %s675_s9 = scalar_lea.vmem %s520_s7, 256  ;;  %p680_p11 = scmp.lt.s32.totalorder %s520_s7, %s520_s7 }
  0x3d   :  { %569 = vmatmul.mubr.msk.f32.vlgmr.msra.gmra.mrb[0].mxu0 %vm68_vm1, %v66_v4  ;;  %574 = vmatmul.mubr.msk.f32.vlgmr.msra.gmra.mrb[0].mxu1 %vm68_vm1, %v67_v6  ;;  %v396_v39 = vsub.s32 %v393_v34, %v395_v35  ;;  %v424_v41 = vunpack.c.0.s8 %v423_v37  ;;  %p676_p10 = scmp.ne.s32.totalorder %s520_s7, %s675_s9  ;;  %p681_p12 = scmp.lt.s32.totalorder %s675_s9, %s675_s9 }
  0x3e   :  { %578 = vmatprep.mubr.msk.f32.mxu0 %vm755_vm0, %v754_v0  ;;  %583 = vmatprep.mubr.msk.f32.mxu1 %vm755_vm0, %v754_v0 }
  0x3f   :  { %577 = vmatpush3.msra.mxu0 %v64_v23  ;;  %582 = vmatpush3.msra.mxu1 %v65_v24  ;;  %v427_v47 = vsub.s32 %v424_v41, %v395_v35  ;;  %p682_p13 = por %p681_p12, %p680_p11 }
  0x41   :  { %p683_p0 = pnand %p682_p13, %p676_p10 }
 0x110   :  { %v141_v7 = vpop.f32.mrb[0].mxu0  ;;  %v217_v8 = vpop.f32.mrb[0].mxu1 }
 0x111   :  { %502 = vst.msk [vmem:[#allocation11] sm:$0xff] %vm221_vm2, %v141_v7  ;;  %v570_v9 = vpop.f32.mrb[1].mxu0  ;;  %v222_v10 = vsel %vm221_vm2, %v141_v7, -inf  ;;  %503 = vst.msk [vmem:[#allocation11 + $0x8] sm:$0xff] %vm221_vm2, %v217_v8  ;;  %v575_v11 = vpop.f32.mrb[1].mxu1  ;;  %v225_v12 = vsel %vm221_vm2, %v217_v8, -inf }
 0x112   :  { %223 = vmax.xlane.f32.xlu0 %v222_v10 }
 0x116   :  { %226 = vmax.xlane.f32.xlu0 %v225_v12 }
 0x19f   :  { %v224_v13 = vpop.xlane.xlu0 %223 }
 0x1a0   :  { %v228_v14 = vsub.f32 %v141_v7, %v224_v13 }
 0x1a2   :  { %v230_v15 = vmul.f32 1.442695, %v228_v14 }
 0x1a3   :  { %v227_v16 = vpop.xlane.xlu0 %226 }
 0x1a4   :  { %601 = vpow2.f32 %v230_v15  ;;  %v229_v17 = vsub.f32 %v217_v8, %v227_v16 }
 0x1a6   :  { %v232_v18 = vmul.f32 1.442695, %v229_v17 }
 0x1a8   :  { %603 = vpow2.f32 %v232_v18 }
 0x1ae   :  { %v602_v19 = vpop.eup %601 }
 0x1af   :  { %v234_v20 = vsel %vm221_vm2, %v602_v19, 0.0 }
 0x1b0   :  { %235 = vadd.xlane.f32.xlu1 %v234_v20 }
 0x1b2   :  { %v604_v21 = vpop.eup %603 }
 0x1b3   :  { %v237_v22 = vsel %vm221_vm2, %v604_v21, 0.0 }
 0x1b4   :  { %238 = vadd.xlane.f32.xlu1 %v237_v22 }
 0x23d   :  { %v236_v25 = vpop.xlane.xlu1 %235 }
 0x23e   :  { %605 = vrcp.f32 %v236_v25 }
 0x241   :  { %v239_v26 = vpop.xlane.xlu1 %238 }
 0x242   :  { %607 = vrcp.f32 %v239_v26 }
 0x248   :  { %v606_v27 = vpop.eup %605 }
 0x249   :  { %v242_v28 = vmul.f32 %v606_v27, %v602_v19 }
 0x24b   :  { %500 = vst.msk [vmem:[#allocation9] sm:$0xff] %vm221_vm2, %v242_v28  ;;  %579 = vmatmul.mubr.msk.f32.vlgmr.msra.gmra.mrb[2].mxu0 %vm221_vm2, %v242_v28 }
 0x24c   :  { %v608_v29 = vpop.eup %607 }
 0x24d   :  { %v243_v30 = vmul.f32 %v608_v29, %v604_v21 }
 0x24f   :  { %501 = vst.msk [vmem:[#allocation9 + $0x8] sm:$0xff] %vm221_vm2, %v243_v30  ;;  %584 = vmatmul.mubr.msk.f32.vlgmr.msra.gmra.mrb[2].mxu1 %vm221_vm2, %v243_v30 }
 0x31e   :  { %v313_v38 = vpop.f32.mrb[2].mxu0 }
 0x31f   :  { %v580_v40 = vpop.f32.mrb[3].mxu0  ;;  %v390_v42 = vcombine.high %v313_v38, %v754_v0  ;;  %v397_v44 = vrot.slane %v313_v38, %v396_v39 }
 0x321   :  { %v404_v49 = vrot.slane %v390_v42, %v396_v39 }
 0x322   :  { %v386_v43 = vpop.f32.mrb[2].mxu1 }
 0x323   :  { %v405_v45 = vcombine.high %v386_v43, %v754_v0  ;;  %v412_v46 = vrot.slane %v386_v43, %v396_v39  ;;  %v585_v48 = vpop.f32.mrb[3].mxu1 }
 0x325   :  { %v419_v50 = vrot.slane %v405_v45, %v396_v39  ;;  %v420_v51 = vcombine.low %v397_v44, %v412_v46  ;;  %v421_v52 = vcombine.high %v397_v44, %v412_v46 }
 0x327   :  { %v428_v53 = vrot.slane %v420_v51, %v427_v47  ;;  %v436_v54 = vcombine.low %v404_v49, %v419_v50  ;;  %v437_v55 = vcombine.high %v404_v49, %v419_v50  ;;  %v435_v56 = vrot.slane %v421_v52, %v427_v47 }
 0x329   :  { %461 = vrot.lane.b32.xlu1 %v435_v56, %s758_s2  ;;  %v452_v57 = vcombine.high %v428_v53, %v754_v0  ;;  %v451_v58 = vrot.slane %v437_v55, %v427_v47  ;;  %v444_v59 = vrot.slane %v436_v54, %v427_v47 }
 0x32b   :  { %457 = vrot.lane.b32.xlu0 %v452_v57, %s760_s8 }
 0x32c   :  { %686 = shalt.err (!%p683_p0)
}
 0x32d   :  { %s687_s12 = scalar_lea.hbm %s928_s4, 256 }
 0x32e   :  { %p688_p1 = scmp.ne.s32.totalorder %s928_s4, %s687_s12  ;;  %p691_p2 = scmp.lt.u32.totalorder %s687_s12, %s928_s4 }
 0x330   :  { %p693_p3 = pnand %p691_p2, %p688_p1 }
 0x332   :  { %696 = shalt.err (!%p693_p3)
}
 0x333   :  { %525 = dma.vmem_to_hbm [thread:$0]  %s520_s7, 256, %s928_s4, [#allocation10], %s751_s30, %s751_s30, %s752_s6   ;;  %v453_v60 = vcombine.high %v435_v56, %v754_v0  ;;  %v454_v61 = vcombine.high %v444_v59, %v754_v0 }
 0x334   :  { %473 = vrot.lane.b32.xlu1 %v451_v58, %s758_s2  ;;  %s761_s18 = smov [#allocation11]   ;;  %s762_s20 = smov 96  }
 0x335   :  { %s531_s19 = sshll.u32 %s761_s18, 4  ;;  %465 = vrot.lane.b32.xlu0 %v453_v60, %s762_s20  ;;  %s532_s19 = int_to_ptr.vmem [resolvable:$true] %s531_s19 }
 0x336   :  { %s697_s22 = scalar_lea.vmem %s532_s19, 256  ;;  %p702_p5 = scmp.lt.s32.totalorder %s532_s19, %s532_s19 }
 0x337   :  { %p698_p4 = scmp.ne.s32.totalorder %s532_s19, %s697_s22  ;;  %p703_p6 = scmp.lt.s32.totalorder %s697_s22, %s697_s22 }
 0x339   :  { %p704_p7 = por %p703_p6, %p702_p5 }
 0x33b   :  { %p705_p8 = pnand %p704_p7, %p698_p4 }
 0x33d   :  { %708 = shalt.err (!%p705_p8)
}
 0x33e   :  { %s709_s4 = scalar_lea.hbm %s929_s5, 256 }
 0x33f   :  { %p710_p9 = scmp.ne.s32.totalorder %s929_s5, %s709_s4  ;;  %p713_p10 = scmp.lt.u32.totalorder %s709_s4, %s929_s5 }
 0x341   :  { %p715_p11 = pnand %p713_p10, %p710_p9 }
 0x343   :  { %718 = shalt.err (!%p715_p11)
}
 0x344   :  { %537 = dma.vmem_to_hbm [thread:$0]  %s532_s19, 256, %s929_s5, [#allocation10], %s751_s30, %s751_s30, %s752_s6   ;;  %v455_v62 = vcombine.high %v451_v58, %v754_v0  ;;  %vm481_vm3 = vcmask 523264   ;;  %vm483_vm4 = vcmask 785408  }
 0x345   :  { %469 = vrot.lane.b32.xlu1 %v454_v61, %s760_s8  ;;  %s763_s2 = smov [#allocation8]  }
 0x346   :  { %s510_s29 = sshll.u32 %s763_s2, 4  ;;  %s511_s29 = int_to_ptr.vmem [resolvable:$true] %s510_s29 }
 0x347   :  { %s719_s5 = scalar_lea.vmem %s511_s29, 64  ;;  %p724_p13 = scmp.lt.s32.totalorder %s511_s29, %s511_s29 }
 0x348   :  { %p720_p12 = scmp.ne.s32.totalorder %s511_s29, %s719_s5  ;;  %p725_p0 = scmp.lt.s32.totalorder %s719_s5, %s719_s5 }
 0x349   :  { %477 = vrot.lane.b32.xlu1 %v455_v62, %s762_s20 }
 0x34a   :  { %p726_p1 = por %p725_p0, %p724_p13 }
 0x34c   :  { %p727_p2 = pnand %p726_p1, %p720_p12 }
 0x39b   :  { %v462_v63 = vpop.permute.xlu1 %461 }
 0x39d   :  { %v458_v1 = vpop.permute.xlu0 %457 }
 0x39e   :  { %v480_v4 = vsel %vm68_vm1, %v428_v53, %v458_v1 }
 0x39f   :  { %v482_v7 = vsel %vm481_vm3, %v480_v4, %v462_v63 }
 0x3a6   :  { %v474_v2 = vpop.permute.xlu1 %473 }
 0x3a7   :  { %v466_v6 = vpop.permute.xlu0 %465 }
 0x3a8   :  { %v484_v10 = vsel %vm483_vm4, %v482_v7, %v466_v6 }
 0x3b7   :  { %v470_v3 = vpop.permute.xlu1 %469 }
 0x3b8   :  { %v485_v5 = vsel %vm68_vm1, %v444_v59, %v470_v3 }
 0x3b9   :  { %v486_v8 = vsel %vm481_vm3, %v485_v5, %v474_v2 }
 0x3bb   :  { %v478_v9 = vpop.permute.xlu1 %477 }
 0x3bc   :  { %v487_v11 = vsel %vm483_vm4, %v486_v8, %v478_v9 }
 0x3bd   :  { %v490_v0 = vcombine.low %v484_v10, %v487_v11 }
 0x3bf   :  { %557 = vst.sshfl [vmem:[#allocation8] sm:$0x33 pattern:$0x76325410] %v490_v0 }
 0x3c0   :  { %730 = shalt.err (!%p727_p2)
}
 0x3c1   :  { %s731_s7 = scalar_lea.hbm %s927_s3, 64 }
 0x3c2   :  { %p732_p3 = scmp.ne.s32.totalorder %s927_s3, %s731_s7  ;;  %p735_p4 = scmp.lt.u32.totalorder %s731_s7, %s927_s3 }
 0x3c4   :  { %p737_p5 = pnand %p735_p4, %p732_p3 }
 0x3c6   :  { %740 = shalt.err (!%p737_p5)
}
 0x3c7   :  { %513 = dma.vmem_to_hbm [thread:$0]  %s511_s29, 64, %s927_s3, [#allocation4]  }
 0x3c8   :  { %745 = dma.done.wait [#allocation4], 64  }
 0x3c9   :  { %746 = vsyncadd [#allocation4], 4294967232 }
 0x3ca   :  { %747 = dma.done.wait [#allocation10], 512  }
 0x3cb   :  { %748 = vsyncadd [#allocation10], 4294966784 }
 0x3cc   :  { %547 = vsyncpa [#allocation3], 1 }
 0x3cd   :  { %548 = vsyncpa [#allocation6], 1 }
 0x3ce   :  { %549 = vsyncpa [#allocation4], 1 }
 0x3cf   :  { %550 = vsyncpa [#allocation10], 1 }

</bundles_post_ra>
